<compile_context>
chip_gen: v7x
topology: tpu7x:2x2x1
jax: 0.10.0
libtpu: 0.0.40
codegen_flags: <defaults>
</compile_context>

<pallas_src>
import functools

import jax
import jax.numpy as jnp
from jax.experimental import pallas as pl
from jax.experimental.pallas import tpu as pltpu

EPS = 1e-10           # self.eps
WEIGHTS = (1.0, 1.0)  # self.ws
_OUT_W = 128          # lane-dense per-batch stats slab width
# match_type = 'dual_doftmax' (not 'sinkhorn')  ->  preds_matrix = -log(scores + eps)


def _matching_stats_kernel(scores_ref, mask_ref, mk0_ref, mk1_ref, std_ref, bmask_ref,
                           out_ref, acc_ref, *, n0, tn0):
    b = pl.program_id(0)
    t = pl.program_id(1)
    nt = pl.num_programs(1)

    @pl.when(t == 0)
    def _init():
        acc_ref[...] = jnp.zeros_like(acc_ref)

    # ---------------- coarse-loss statistics (streamed (TN0, N1) tiles) ----------------
    s = scores_ref[0].astype(jnp.float32)        # upcast in-kernel; HBM carries native dtype
    a = mask_ref[0] != 0                         # bool mask from the int8 stream

    if n0 % tn0 != 0:                            # tail-tile row masking (trace-time branch)
        row = jax.lax.broadcasted_iota(jnp.int32, a.shape, 0) + t * tn0
        a = jnp.logical_and(a, row < n0)

    # TODO(synk): if EUP becomes the binding unit after the byte cuts, fold -log into the
    # upstream dual-softmax (log-softmax) so the kernel only sums a * logp.
    p = -jnp.log(s + EPS)                        # non-sinkhorn branch: -log(scores + eps)
    mp = jnp.where(a, p, 0.0)
    af = a.astype(jnp.float32)

    # Sublane-only reduce per tile; the cross-lane reduce is deferred to the finalize step.
    acc_ref[0:1, :] += jnp.sum(mp, axis=0, keepdims=True)
    acc_ref[1:2, :] += jnp.sum(af, axis=0, keepdims=True)

    # ---------------- finalize: lane reduce + O(K) fine-loss statistics ----------------
    @pl.when(t == nt - 1)
    def _finalize():
        csum = jnp.sum(acc_ref[0:1, :], axis=1, keepdims=True)   # (1, 1)
        ccnt = jnp.sum(acc_ref[1:2, :], axis=1, keepdims=True)

        # TODO(synk): reference reprojects mkpts0 via image0.unproject / image1.project
        # (undefined `Image` class in the source); identity projection is used here.
        dx = mk1_ref[0:1, :] - mk0_ref[0:1, :]                   # (1, K)
        dy = mk1_ref[1:2, :] - mk0_ref[1:2, :]
        dist = jnp.sqrt(dx * dx + dy * dy)                       # == torch.norm(.., dim=-1)
        inv = 1.0 / jnp.maximum(std_ref[...], EPS)               # 1 / clamp(std, min=eps)
        bm = bmask_ref[pl.ds(b, 1), :]                           # (1, K) row of this batch
        finv = jnp.sum(bm * inv, axis=1, keepdims=True)
        finvd = jnp.sum(bm * inv * dist, axis=1, keepdims=True)
        fcnt = jnp.sum(bm, axis=1, keepdims=True)

        # Pack the 5 per-batch stats into one lane-dense (8, 128) slab write.
        lane = jax.lax.broadcasted_iota(jnp.int32, (8, _OUT_W), 1)
        out_ref[0] = (jnp.where(lane == 0, csum, 0.0) +
                      jnp.where(lane == 1, ccnt, 0.0) +
                      jnp.where(lane == 2, finv, 0.0) +
                      jnp.where(lane == 3, finvd, 0.0) +
                      jnp.where(lane == 4, fcnt, 0.0))


def _pick_tile_n0(n0, n1, scores_dtype):
    """Largest N0-tile whose double-buffered (scores + int8 mask) footprint fits ~24 MiB."""
    sb = jnp.dtype(scores_dtype).itemsize
    budget = 24 * 1024 * 1024
    per_row = 2 * (sb + 1) * n1                # 2x = BlockSpec double-buffering; +1 B int8 mask
    max_rows = max(32, budget // max(per_row, 1))
    if n0 <= max_rows:
        return n0                              # full-N0 block (always layout-legal)
    tn0 = min(int(max_rows), 1024)             # diminishing returns past ~512-1024 sublanes
    return max(32, (tn0 // 32) * 32)           # int8 mask needs the sublane tile % 32 == 0


def matching_criterion(scores, assignments, mkpts0, mkpts1, std, match_batch_ids,
                       weights=WEIGHTS, tile_n0=None):
    """Pallas implementation of MatchingCriterion.forward (losses dict). Forward only.

    TODO(synk): wrap in jax.custom_vjp if gradients through this loss are required.
    """
    B, N0, N1 = scores.shape
    K = mkpts0.shape[0]

    # Glue / layout prep (no f32 widening of the big mask; scores stay in native dtype).
    mask_i8 = assignments if assignments.dtype == jnp.int8 else assignments.astype(jnp.int8)
    mk0_t = mkpts0.T.astype(jnp.float32)                      # (2, K)
    mk1_t = mkpts1.T.astype(jnp.float32)                      # (2, K)
    std_t = std.reshape(1, K).astype(jnp.float32)             # (1, K)
    bmask = (match_batch_ids[None, :] ==
             jnp.arange(B, dtype=match_batch_ids.dtype)[:, None]).astype(jnp.float32)  # (B, K)

    tn0 = tile_n0 if tile_n0 is not None else _pick_tile_n0(N0, N1, scores.dtype)
    assert tn0 == N0 or tn0 % 32 == 0, "N0 tile must be full N0 or a multiple of 32"
    nt = pl.cdiv(N0, tn0)

    kernel = functools.partial(_matching_stats_kernel, n0=N0, tn0=tn0)

    stats = pl.pallas_call(
        kernel,
        out_shape=jax.ShapeDtypeStruct((B, 8, _OUT_W), jnp.float32),
        grid_spec=pltpu.PrefetchScalarGridSpec(
            num_scalar_prefetch=0,
            grid=(B, nt),                                              # reduction axis last
            in_specs=[
                pl.BlockSpec((1, tn0, N1), lambda b, t: (b, t, 0)),    # scores tile (native dtype)
                pl.BlockSpec((1, tn0, N1), lambda b, t: (b, t, 0)),    # int8 assignment tile
                pl.BlockSpec((2, K), lambda b, t: (0, 0)),             # mkpts0.T (DMA'd once)
                pl.BlockSpec((2, K), lambda b, t: (0, 0)),             # mkpts1.T
                pl.BlockSpec((1, K), lambda b, t: (0, 0)),             # std
                pl.BlockSpec((B, K), lambda b, t: (0, 0)),             # per-batch match mask
            ],
            out_specs=pl.BlockSpec((1, 8, _OUT_W), lambda b, t: (b, 0, 0)),
            scratch_shapes=[pltpu.VMEM((2, N1), jnp.float32)],         # resident accumulator
        ),
        compiler_params=pltpu.CompilerParams(
            dimension_semantics=("parallel", "arbitrary"),             # batch sharded over TCs
            vmem_limit_bytes=48 * 1024 * 1024),
    )(scores, mask_i8, mk0_t, mk1_t, std_t, bmask)

    csum, ccnt = stats[:, 0, 0], stats[:, 0, 1]
    finv, finvd, fcnt = stats[:, 0, 2], stats[:, 0, 3], stats[:, 0, 4]

    # ---- coarse loss: per-batch mean of masked -log(scores); zero-match batches contribute 0
    #      but stay in the denominator (matches the reference loop + `continue` semantics).
    safe_cnt = jnp.where(ccnt > 0, ccnt, 1.0)
    coarse_per_b = jnp.where(ccnt > 0, csum / safe_cnt, 0.0)
    coarse_loss = jnp.sum(coarse_per_b) / float(B)

    # ---- fine loss: weight = inv_std / mean(inv_std); mean(weight*dist) == sum(inv*d)/sum(inv).
    #      Reference uses std/dist from the *last* batch with matches (loop-overwrite semantics).
    has = fcnt > 0
    idx = jnp.arange(B)
    b_star = jnp.max(jnp.where(has, idx, -1))
    per_b_fine = finvd / jnp.maximum(finv, EPS)
    # TODO(synk): if no batch has matches the reference raises NoGradientError; returns 0 here.
    fine_loss = jnp.where(b_star >= 0,
                          jnp.take(per_b_fine, jnp.maximum(b_star, 0)), 0.0) / float(B)

    losses = weights[0] * coarse_loss + weights[1] * fine_loss
    # Key 'coarse_loss:' (stray colon) intentionally matches the reference dict.
    return {'losses': losses, 'coarse_loss:': coarse_loss, 'fine_loss': fine_loss}


def _reference(scores, assignments, mkpts0, mkpts1, std, mb, weights=WEIGHTS):
    """Pure-JAX reference mirroring the PyTorch module semantics (test-only)."""
    B = scores.shape[0]
    p = -jnp.log(scores.astype(jnp.float32) + EPS)
    a = assignments.astype(jnp.float32)
    csum = jnp.sum(a * p, axis=(1, 2))
    ccnt = jnp.sum(a, axis=(1, 2))
    coarse = jnp.sum(jnp.where(ccnt > 0, csum / jnp.where(ccnt > 0, ccnt, 1.0), 0.0)) / B
    dist = jnp.sqrt(jnp.sum((mkpts1 - mkpts0).astype(jnp.float32) ** 2, axis=-1))
    inv = 1.0 / jnp.maximum(std.astype(jnp.float32), EPS)
    fine_last = jnp.float32(0.0)
    for b in range(B):                                      # eager loop, test sizes only
        sel = (mb == b)
        if int(jnp.sum(sel)) > 0:
            w = jnp.where(sel, inv, 0.0)
            fine_last = jnp.sum(w * dist) / jnp.sum(w)      # last batch with matches wins
    fine = fine_last / B
    return weights[0] * coarse + weights[1] * fine, coarse, fine


if __name__ == "__main__":
    key = jax.random.PRNGKey(0)
    B, N0, N1, K = 2, 64, 64, 16

    k1, k2, k3, k4 = jax.random.split(key, 4)

    # scores in (0,1) like a dual-softmax output
    scores = jax.nn.softmax(jax.random.normal(k1, (B, N0, N1), jnp.float32), axis=-1)

    # boolean assignment matrix: 8 diagonal matches per batch
    diag = jnp.arange(8)
    assignments = jnp.zeros((B, N0, N1), dtype=bool).at[:, diag, diag].set(True)

    # fine-level matches: K = 16 total, 8 per batch (matches[:, 0] == batch id)
    match_batch_ids = jnp.concatenate([jnp.zeros(8, jnp.int32), jnp.ones(8, jnp.int32)])
    mkpts0 = 10.0 * jax.random.normal(k2, (K, 2), jnp.float32)
    mkpts1 = mkpts0 + jax.random.normal(k3, (K, 2), jnp.float32)
    std = 0.1 + 0.9 * jax.random.uniform(k4, (K,), jnp.float32)

    # tile_n0=32 forces a 2-step reduction axis (grid=(B, 2)) so the resident accumulator
    # and the pl.when init/finalize path are exercised even at these small test shapes.
    out = matching_criterion(scores, assignments, mkpts0, mkpts1, std, match_batch_ids,
                             tile_n0=32)
    jax.block_until_ready(out['losses'])

    ref_losses, ref_coarse, ref_fine = _reference(scores, assignments, mkpts0, mkpts1,
                                                  std, match_batch_ids)
    assert bool(jnp.isfinite(out['losses']))
    assert abs(float(out['losses']) - float(ref_losses)) < 1e-5 * max(1.0, abs(float(ref_losses)))
    assert abs(float(out['coarse_loss:']) - float(ref_coarse)) < 1e-5 * max(1.0, abs(float(ref_coarse)))
    assert abs(float(out['fine_loss']) - float(ref_fine)) < 1e-5 * max(1.0, abs(float(ref_fine)))
    print("KERNEL_OK")
</pallas_src>

<mosaic_0001>
module attributes {stable_mosaic.version = 11 : i64} {
  func.func @_matching_stats_kernel(%arg0: i32, %arg1: i32, %arg2: memref<1x32x64xf32, #tpu.memory_space<vmem>>, %arg3: memref<1x32x64xi8, #tpu.memory_space<vmem>>, %arg4: memref<2x16xf32, #tpu.memory_space<vmem>>, %arg5: memref<2x16xf32, #tpu.memory_space<vmem>>, %arg6: memref<1x16xf32, #tpu.memory_space<vmem>>, %arg7: memref<2x16xf32, #tpu.memory_space<vmem>>, %arg8: memref<1x8x128xf32, #tpu.memory_space<vmem>>, %arg9: memref<2x64xf32, #tpu.memory_space<vmem>>) attributes {dimension_semantics = [#tpu.dimension_semantics<parallel>, #tpu.dimension_semantics<arbitrary>], iteration_bounds = array<i64: 2, 2>, scalar_prefetch = 0 : i64, scratch_operands = 1 : i64, tpu.core_type = #tpu.core_type<tc>, window_params = [{transform_indices = @transform_0, window_bounds = array<i64: 1, 32, 64>}, {transform_indices = @transform_1, window_bounds = array<i64: 1, 32, 64>}, {pipeline_mode = #tpu.pipeline_mode<synchronous>, transform_indices = @transform_2, window_bounds = array<i64: 2, 16>}, {pipeline_mode = #tpu.pipeline_mode<synchronous>, transform_indices = @transform_3, window_bounds = array<i64: 2, 16>}, {pipeline_mode = #tpu.pipeline_mode<synchronous>, transform_indices = @transform_4, window_bounds = array<i64: 1, 16>}, {pipeline_mode = #tpu.pipeline_mode<synchronous>, transform_indices = @transform_5, window_bounds = array<i64: 2, 16>}, {transform_indices = @transform_6, window_bounds = array<i64: 1, 8, 128>}]} {
    %c0_i32 = arith.constant 0 : i32
    %0 = arith.cmpi eq, %arg1, %c0_i32 : i32
    %1 = arith.extui %0 : i1 to i32
    %c0_i32_0 = arith.constant 0 : i32
    %2 = arith.cmpi ne, %1, %c0_i32_0 : i32
    scf.if %2 {
      %cst_18 = arith.constant 0.000000e+00 : f32
      %31 = vector.broadcast %cst_18 : f32 to vector<2x64xf32>
      %c0_19 = arith.constant 0 : index
      %c0_20 = arith.constant 0 : index
      %32 = vector.load %arg9[%c0_19, %c0_20] : memref<2x64xf32, #tpu.memory_space<vmem>>, vector<2x64xf32>
      tpu.vector_store %arg9[%c0_19, %c0_20], %31 {strides = array<i32>} : memref<2x64xf32, #tpu.memory_space<vmem>>, vector<2x64xf32>,
    } else {
    }
    %c0 = arith.constant 0 : index
    %c0_1 = arith.constant 0 : index
    %c0_2 = arith.constant 0 : index
    %3 = vector.load %arg2[%c0, %c0_1, %c0_2] : memref<1x32x64xf32, #tpu.memory_space<vmem>>, vector<1x32x64xf32>
    %4 = vector.shape_cast %3 : vector<1x32x64xf32> to vector<32x64xf32>
    %c0_3 = arith.constant 0 : index
    %c0_4 = arith.constant 0 : index
    %c0_5 = arith.constant 0 : index
    %5 = vector.load %arg3[%c0_3, %c0_4, %c0_5] : memref<1x32x64xi8, #tpu.memory_space<vmem>>, vector<1x32x64xi8>
    %6 = vector.shape_cast %5 : vector<1x32x64xi8> to vector<32x64xi8>
    %c0_i8 = arith.constant 0 : i8
    %7 = vector.broadcast %c0_i8 : i8 to vector<32x64xi8>
    %8 = arith.cmpi ne, %6, %7 : vector<32x64xi8>
    %cst = arith.constant 1.000000e-10 : f32
    %9 = vector.broadcast %cst : f32 to vector<32x64xf32>
    %10 = arith.addf %4, %9 : vector<32x64xf32>
    %11 = math.log %10 : vector<32x64xf32>
    %cst_6 = arith.constant 0.000000e+00 : f32
    %12 = vector.broadcast %cst_6 : f32 to vector<32x64xf32>
    %13 = arith.subf %12, %11 : vector<32x64xf32>
    %cst_7 = arith.constant 0.000000e+00 : f32
    %14 = vector.broadcast %cst_7 : f32 to vector<32x64xf32>
    %15 = arith.select %8, %13, %14 : vector<32x64xi1>, vector<32x64xf32>
    %16 = arith.extui %8 : vector<32x64xi1> to vector<32x64xi32>
    %17 = arith.sitofp %16 : vector<32x64xi32> to vector<32x64xf32>
    %c0_8 = arith.constant 0 : index
    %c0_9 = arith.constant 0 : index
    %18 = vector.load %arg9[%c0_8, %c0_9] : memref<2x64xf32, #tpu.memory_space<vmem>>, vector<1x64xf32>
    %cst_10 = arith.constant dense<0.000000e+00> : vector<64xf32>
    %19 = vector.multi_reduction <add>, %15, %cst_10 [0] : vector<32x64xf32> to vector<64xf32>
    %20 = vector.shape_cast %19 : vector<64xf32> to vector<1x64xf32>
    %21 = arith.addf %18, %20 : vector<1x64xf32>
    %c0_11 = arith.constant 0 : index
    %c0_12 = arith.constant 0 : index
    %22 = vector.load %arg9[%c0_11, %c0_12] : memref<2x64xf32, #tpu.memory_space<vmem>>, vector<1x64xf32>
    tpu.vector_store %arg9[%c0_11, %c0_12], %21 {strides = array<i32>} : memref<2x64xf32, #tpu.memory_space<vmem>>, vector<1x64xf32>,
    %c1 = arith.constant 1 : index
    %c0_13 = arith.constant 0 : index
    %23 = vector.load %arg9[%c1, %c0_13] : memref<2x64xf32, #tpu.memory_space<vmem>>, vector<1x64xf32>
    %cst_14 = arith.constant dense<0.000000e+00> : vector<64xf32>
    %24 = vector.multi_reduction <add>, %17, %cst_14 [0] : vector<32x64xf32> to vector<64xf32>
    %25 = vector.shape_cast %24 : vector<64xf32> to vector<1x64xf32>
    %26 = arith.addf %23, %25 : vector<1x64xf32>
    %c1_15 = arith.constant 1 : index
    %c0_16 = arith.constant 0 : index
    %27 = vector.load %arg9[%c1_15, %c0_16] : memref<2x64xf32, #tpu.memory_space<vmem>>, vector<1x64xf32>
    tpu.vector_store %arg9[%c1_15, %c0_16], %26 {strides = array<i32>} : memref<2x64xf32, #tpu.memory_space<vmem>>, vector<1x64xf32>,
    %c1_i32 = arith.constant 1 : i32
    %28 = arith.cmpi eq, %arg1, %c1_i32 : i32
    %29 = arith.extui %28 : i1 to i32
    %c0_i32_17 = arith.constant 0 : i32
    %30 = arith.cmpi ne, %29, %c0_i32_17 : i32
    scf.if %30 {
      %c0_18 = arith.constant 0 : index
      %c0_19 = arith.constant 0 : index
      %31 = vector.load %arg9[%c0_18, %c0_19] : memref<2x64xf32, #tpu.memory_space<vmem>>, vector<1x64xf32>
      %cst_20 = arith.constant dense<0.000000e+00> : vector<1xf32>
      %32 = vector.multi_reduction <add>, %31, %cst_20 [1] : vector<1x64xf32> to vector<1xf32>
      %33 = vector.shape_cast %32 : vector<1xf32> to vector<1x1xf32>
      %c1_21 = arith.constant 1 : index
      %c0_22 = arith.constant 0 : index
      %34 = vector.load %arg9[%c1_21, %c0_22] : memref<2x64xf32, #tpu.memory_space<vmem>>, vector<1x64xf32>
      %cst_23 = arith.constant dense<0.000000e+00> : vector<1xf32>
      %35 = vector.multi_reduction <add>, %34, %cst_23 [1] : vector<1x64xf32> to vector<1xf32>
      %36 = vector.shape_cast %35 : vector<1xf32> to vector<1x1xf32>
      %c0_24 = arith.constant 0 : index
      %c0_25 = arith.constant 0 : index
      %37 = vector.load %arg5[%c0_24, %c0_25] : memref<2x16xf32, #tpu.memory_space<vmem>>, vector<1x16xf32>
      %c0_26 = arith.constant 0 : index
      %c0_27 = arith.constant 0 : index
      %38 = vector.load %arg4[%c0_26, %c0_27] : memref<2x16xf32, #tpu.memory_space<vmem>>, vector<1x16xf32>
      %39 = arith.subf %37, %38 : vector<1x16xf32>
      %c1_28 = arith.constant 1 : index
      %c0_29 = arith.constant 0 : index
      %40 = vector.load %arg5[%c1_28, %c0_29] : memref<2x16xf32, #tpu.memory_space<vmem>>, vector<1x16xf32>
      %c1_30 = arith.constant 1 : index
      %c0_31 = arith.constant 0 : index
      %41 = vector.load %arg4[%c1_30, %c0_31] : memref<2x16xf32, #tpu.memory_space<vmem>>, vector<1x16xf32>
      %42 = arith.subf %40, %41 : vector<1x16xf32>
      %43 = arith.mulf %39, %39 : vector<1x16xf32>
      %44 = arith.mulf %42, %42 : vector<1x16xf32>
      %45 = arith.addf %43, %44 : vector<1x16xf32>
      %46 = math.sqrt %45 : vector<1x16xf32>
      %c0_32 = arith.constant 0 : index
      %c0_33 = arith.constant 0 : index
      %47 = vector.load %arg6[%c0_32, %c0_33] : memref<1x16xf32, #tpu.memory_space<vmem>>, vector<1x16xf32>
      %cst_34 = arith.constant 1.000000e-10 : f32
      %48 = vector.broadcast %cst_34 : f32 to vector<1x16xf32>
      %49 = arith.maximumf %47, %48 : vector<1x16xf32>
      %cst_35 = arith.constant 1.000000e+00 : f32
      %50 = vector.broadcast %cst_35 : f32 to vector<1x16xf32>
      %51 = arith.divf %50, %49 : vector<1x16xf32>
      %52 = arith.index_cast %arg0 : i32 to index
      %c0_36 = arith.constant 0 : index
      %53 = vector.load %arg7[%52, %c0_36] : memref<2x16xf32, #tpu.memory_space<vmem>>, vector<1x16xf32>
      %54 = arith.mulf %53, %51 : vector<1x16xf32>
      %cst_37 = arith.constant dense<0.000000e+00> : vector<1xf32>
      %55 = vector.multi_reduction <add>, %54, %cst_37 [1] : vector<1x16xf32> to vector<1xf32>
      %56 = vector.shape_cast %55 : vector<1xf32> to vector<1x1xf32>
      %57 = arith.mulf %53, %51 : vector<1x16xf32>
      %58 = arith.mulf %57, %46 : vector<1x16xf32>
      %cst_38 = arith.constant dense<0.000000e+00> : vector<1xf32>
      %59 = vector.multi_reduction <add>, %58, %cst_38 [1] : vector<1x16xf32> to vector<1xf32>
      %60 = vector.shape_cast %59 : vector<1xf32> to vector<1x1xf32>
      %cst_39 = arith.constant dense<0.000000e+00> : vector<1xf32>
      %61 = vector.multi_reduction <add>, %53, %cst_39 [1] : vector<1x16xf32> to vector<1xf32>
      %62 = vector.shape_cast %61 : vector<1xf32> to vector<1x1xf32>
      %63 = tpu.iota {dimensions = array<i32: 1>} : vector<8x128xi32>
      %c0_i32_40 = arith.constant 0 : i32
      %64 = vector.broadcast %c0_i32_40 : i32 to vector<8x128xi32>
      %65 = arith.cmpi eq, %63, %64 : vector<8x128xi32>
      %cst_41 = arith.constant 0.000000e+00 : f32
      %66 = vector.shape_cast %33 : vector<1x1xf32> to vector<1x1xf32>
      %67 = vector.broadcast %66 : vector<1x1xf32> to vector<8x128xf32>
      %68 = vector.broadcast %cst_41 : f32 to vector<8x128xf32>
      %69 = arith.select %65, %67, %68 : vector<8x128xi1>, vector<8x128xf32>
      %c1_i32_42 = arith.constant 1 : i32
      %70 = vector.broadcast %c1_i32_42 : i32 to vector<8x128xi32>
      %71 = arith.cmpi eq, %63, %70 : vector<8x128xi32>
      %cst_43 = arith.constant 0.000000e+00 : f32
      %72 = vector.shape_cast %36 : vector<1x1xf32> to vector<1x1xf32>
      %73 = vector.broadcast %72 : vector<1x1xf32> to vector<8x128xf32>
      %74 = vector.broadcast %cst_43 : f32 to vector<8x128xf32>
      %75 = arith.select %71, %73, %74 : vector<8x128xi1>, vector<8x128xf32>
      %76 = arith.addf %69, %75 : vector<8x128xf32>
      %c2_i32 = arith.constant 2 : i32
      %77 = vector.broadcast %c2_i32 : i32 to vector<8x128xi32>
      %78 = arith.cmpi eq, %63, %77 : vector<8x128xi32>
      %cst_44 = arith.constant 0.000000e+00 : f32
      %79 = vector.shape_cast %56 : vector<1x1xf32> to vector<1x1xf32>
      %80 = vector.broadcast %79 : vector<1x1xf32> to vector<8x128xf32>
      %81 = vector.broadcast %cst_44 : f32 to vector<8x128xf32>
      %82 = arith.select %78, %80, %81 : vector<8x128xi1>, vector<8x128xf32>
      %83 = arith.addf %76, %82 : vector<8x128xf32>
      %c3_i32 = arith.constant 3 : i32
      %84 = vector.broadcast %c3_i32 : i32 to vector<8x128xi32>
      %85 = arith.cmpi eq, %63, %84 : vector<8x128xi32>
      %cst_45 = arith.constant 0.000000e+00 : f32
      %86 = vector.shape_cast %60 : vector<1x1xf32> to vector<1x1xf32>
      %87 = vector.broadcast %86 : vector<1x1xf32> to vector<8x128xf32>
      %88 = vector.broadcast %cst_45 : f32 to vector<8x128xf32>
      %89 = arith.select %85, %87, %88 : vector<8x128xi1>, vector<8x128xf32>
      %90 = arith.addf %83, %89 : vector<8x128xf32>
      %c4_i32 = arith.constant 4 : i32
      %91 = vector.broadcast %c4_i32 : i32 to vector<8x128xi32>
      %92 = arith.cmpi eq, %63, %91 : vector<8x128xi32>
      %cst_46 = arith.constant 0.000000e+00 : f32
      %93 = vector.shape_cast %62 : vector<1x1xf32> to vector<1x1xf32>
      %94 = vector.broadcast %93 : vector<1x1xf32> to vector<8x128xf32>
      %95 = vector.broadcast %cst_46 : f32 to vector<8x128xf32>
      %96 = arith.select %92, %94, %95 : vector<8x128xi1>, vector<8x128xf32>
      %97 = arith.addf %90, %96 : vector<8x128xf32>
      %c0_47 = arith.constant 0 : index
      %c0_48 = arith.constant 0 : index
      %c0_49 = arith.constant 0 : index
      %98 = vector.load %arg8[%c0_47, %c0_48, %c0_49] : memref<1x8x128xf32, #tpu.memory_space<vmem>>, vector<1x8x128xf32>
      %99 = vector.shape_cast %98 : vector<1x8x128xf32> to vector<8x128xf32>
      %100 = vector.shape_cast %97 : vector<8x128xf32> to vector<1x8x128xf32>
      tpu.vector_store %arg8[%c0_47, %c0_48, %c0_49], %100 {strides = array<i32>} : memref<1x8x128xf32, #tpu.memory_space<vmem>>, vector<1x8x128xf32>,
    } else {
    }
    return
  }
  func.func @transform_0(%arg0: i32, %arg1: i32) -> (i32, i32, i32) {
    %c0_i32 = arith.constant 0 : i32
    %c0_i32_0 = arith.constant 0 : i32
    return %arg0, %arg1, %c0_i32 : i32, i32, i32
  }
  func.func @transform_1(%arg0: i32, %arg1: i32) -> (i32, i32, i32) {
    %c0_i32 = arith.constant 0 : i32
    %c0_i32_0 = arith.constant 0 : i32
    return %arg0, %arg1, %c0_i32 : i32, i32, i32
  }
  func.func @transform_2(%arg0: i32, %arg1: i32) -> (i32, i32) {
    %c0_i32 = arith.constant 0 : i32
    %c0_i32_0 = arith.constant 0 : i32
    %c0_i32_1 = arith.constant 0 : i32
    return %c0_i32, %c0_i32_0 : i32, i32
  }
  func.func @transform_3(%arg0: i32, %arg1: i32) -> (i32, i32) {
    %c0_i32 = arith.constant 0 : i32
    %c0_i32_0 = arith.constant 0 : i32
    %c0_i32_1 = arith.constant 0 : i32
    return %c0_i32, %c0_i32_0 : i32, i32
  }
  func.func @transform_4(%arg0: i32, %arg1: i32) -> (i32, i32) {
    %c0_i32 = arith.constant 0 : i32
    %c0_i32_0 = arith.constant 0 : i32
    %c0_i32_1 = arith.constant 0 : i32
    return %c0_i32, %c0_i32_0 : i32, i32
  }
  func.func @transform_5(%arg0: i32, %arg1: i32) -> (i32, i32) {
    %c0_i32 = arith.constant 0 : i32
    %c0_i32_0 = arith.constant 0 : i32
    %c0_i32_1 = arith.constant 0 : i32
    return %c0_i32, %c0_i32_0 : i32, i32
  }
  func.func @transform_6(%arg0: i32, %arg1: i32) -> (i32, i32, i32) {
    %c0_i32 = arith.constant 0 : i32
    %c0_i32_0 = arith.constant 0 : i32
    %c0_i32_1 = arith.constant 0 : i32
    return %arg0, %c0_i32, %c0_i32_0 : i32, i32, i32
  }
}

</mosaic_0001>

<bundles_post_ra>
// kernel: tpu_custom_call.1
= control target key start
LH: loop header
LB: loop body
LE: loop exit
PB: predicated region body
PF: predicated region fallthrough
CT: control target
= control target key end

     0   :  { %s1350_s0 = inlined_call_operand.hbm [shape: f32[2,64,64], index: 0, kind: input, shape index: {}]   ;;  %s1351_s1 = inlined_call_operand.hbm [shape: s8[2,64,64], index: 1, kind: input, shape index: {}]   ;;  %s1352_s2 = inlined_call_operand.vmem [shape: f32[2,16], index: 2, kind: input, shape index: {}]   ;;  %s1353_s3 = inlined_call_operand.vmem [shape: f32[2,16], index: 3, kind: input, shape index: {}]   ;;  %s1354_s4 = inlined_call_operand.vmem [shape: f32[1,16], index: 4, kind: input, shape index: {}]   ;;  %s1355_s5 = inlined_call_operand.vmem [shape: f32[2,16], index: 5, kind: input, shape index: {}]   ;;  %s1356_s6 = inlined_call_operand.hbm [shape: f32[2,8,128], index: 6, kind: output, shape index: {}]  }
   0x1   :  { %1368 = sst [smem:[#allocation21_spill]] %s1350_s0 }
   0x2   :  { %1369 = sst [smem:[#allocation22_spill]] %s1356_s6 }
   0x3   :  { %11 = vsyncpa [#allocation4], 0 }
   0x4   :  { %13 = vsyncpa [#allocation4 + $0x1], 0 }
   0x5   :  { %14 = vsyncpa [#allocation7], 0 }
   0x6   :  { %16 = vsyncpa [#allocation7 + $0x1], 0 }
   0x7   :  { %17 = vsyncpa [#allocation5], 0 }
   0x8   :  { %19 = vsyncpa [#allocation5 + $0x1], 0  ;;  %s1020_s21 = smov 0   ;;  %s1022_s22 = smov 0  }
   0x9   :  { %s1024_s23 = smov 0   ;;  %s1026_s24 = smov 0  }
   0xa   :  { %s1028_s25 = smov 0   ;;  %s1030_s26 = smov 0  }
   0xb   :  { %s1032_s27 = smov 0   ;;  %s1034_s28 = smov 0  }
   0xc   :  { %s1036_s29 = smov 0   ;;  %s1038_s30 = smov 0  }
   0xd   :  { %s1040_s7 = smov 0  }
   0xe LB: > { %1370 = sst [smem:[#allocation12_spill]] %s935_s21  ;;  %s640_s8 = sadd.s32 4294967295, %s975_s7   ;;  %s975_s7 = sphi %s1040_s7, %s25_s7   ;;  %s971_s30 = sphi %s1038_s30, %s1414_s30   ;;  %s967_s29 = sphi %s1036_s29, %s1413_s29   ;;  %s963_s28 = sphi %s1034_s28, %s1412_s28   ;;  %s959_s27 = sphi %s1032_s27, %s1411_s27   ;;  %s955_s26 = sphi %s1030_s26, %s1404_s26   ;;  %s951_s25 = sphi %s1028_s25, %s1410_s25   ;;  %s947_s24 = sphi %s1026_s24, %s1409_s24   ;;  %s943_s23 = sphi %s1024_s23, %s1402_s23   ;;  %s939_s22 = sphi %s1022_s22, %s1408_s22   ;;  %s935_s21 = sphi %s1020_s21, %s1407_s21  }
   0xf   : > { %1371 = sst [smem:[#allocation13_spill]] %s943_s23  ;;  %s641_s9 = sadd.s32 4294967294, %s975_s7  }
  0x10   : > { %1372 = sst [smem:[#allocation14_spill]] %s955_s26  ;;  %s34_s10 = sadd.s32 1, %s967_s29 }
  0x11   : > { %s37_s11 = sadd.s32 1, %s971_s30  ;;  %p35_p0 = scmp.ge.s32.totalorder %s34_s10, 2 }
  0x12   : > { %s46_s12 = sadd.s32 1, %s955_s26  ;;  %p53_p1 = scmp.ne.s32.totalorder %s955_s26, %s951_s25 }
  0x13   : > { %p54_p2 = scmp.eq.s32.totalorder %s975_s7, 0  ;;  %s1416_s10 = smov (%p35_p0, %s34_s10), 0 }
  0x14   : > { %1373 = sst [smem:[#allocation15_spill]] %s1416_s10  ;;  %s1418_s11 = smov (!%p35_p0, %s37_s11), %s971_s30 }
  0x15   : > { %s42_s13 = ssub.s32 %s967_s29, %s1416_s10  ;;  %p1086_p3 = por %p54_p2, %p53_p1 }
  0x16   : > { %p39_p4 = scmp.ge.s32.totalorder %s1418_s11, 2  ;;  %p59_p5 = scmp.ne.s32.totalorder %s951_s25, %s947_s24 }
  0x17   : > { %p60_p6 = scmp.eq.s32.totalorder %s640_s8, 0  ;;  %s184_s15 = sadd.s32 1, %s943_s23 }
  0x18   : > { %s1420_s11 = smov (%p39_p4, %s1418_s11), 0  ;;  %p194_p8 = scmp.ne.s32.totalorder %s943_s23, %s939_s22 }
  0x19   : > { %1375 = sst [smem:[#allocation16_spill]] %s1420_s11  ;;  %p1094_p7 = por %p60_p6, %p59_p5 }
  0x1a   : > { %s41_s17 = ssub.s32 %s971_s30, %s1420_s11  ;;  %p195_p9 = scmp.eq.s32.totalorder %s640_s8, 3 }
  0x1b   : > { %s1376_s16 = scalar_select %p1094_p7, 1, 0 }
  0x1c   : > { %s43_s18 = sor.u32 %s42_s13, %s41_s17  ;;  %p182_p10 = scmp.eq.s32.totalorder %s41_s17, 0 }
  0x1d   : > { %p44_p11 = scmp.eq.s32.totalorder %s43_s18, 0  ;;  %p1102_p12 = por %p195_p9, %p194_p8 }
  0x1e   : > { %s1107_s20 = scalar_select %p182_p10, %s943_s23, %s184_s15  }
  0x1f   : > { %s1377_s19 = scalar_select %p1102_p12, 1, 0 }
  0x20   : > { %1379 = sst [smem:[#allocation18_spill]] %s1107_s20  ;;  %p200_p13 = scmp.ne.s32.totalorder %s939_s22, %s935_s21 }
  0x21   : > { %1378 = sst [smem:[#allocation17_spill]] %s1377_s19  ;;  %p201_p0 = scmp.eq.s32.totalorder %s641_s9, 3 }
  0x22   : > { %s1110_s24 = scalar_select %p44_p11, %s955_s26, %s46_s12  }
  0x23   : > { %p682_p1 = scmp.lt.s32.totalorder %s975_s7, 4  ;;  %p1115_p2 = por %p201_p0, %p200_p13 }
  0x24   : > { %1380 = sst [smem:[#allocation19_spill]] %s1110_s24  ;;  %s1120_s8 = sand.u32 1, %s955_s26  }
  0x25   : > { %s1381_s10 = scalar_select %p1115_p2, 1, 0 }
  0x26   : > { %s644_s13 = sshll.u32 %s1120_s8, 5  ;;  %s645_s17 = sshll.u32 %s967_s29, 2 }
  0x27   : > { %1382 = sst [smem:[#allocation20_spill]] %s1381_s10  ;;  %s646_s18 = sshll.u32 %s971_s30, 3 }
  0x28   : > { %s237_s11 = scalar_lea.vmem [#allocation3], %s644_s13  ;;  %s243_s15 = sadd.s32 %s646_s18, %s645_s17 }
  0x29   : > { %s246_s6 = sshll.u32 %s237_s11, 4  ;;  %s647_s12 = sshll.u32 %s243_s15, 7  ;;  %s1125_s6 = int_to_ptr.vmem [resolvable:$true] %s246_s6 }
  0x2a   : > { %p1129_p4 = pnand %p682_p1, %p1086_p3  ;;  %s1384_s0 = sld [smem:[#allocation21_spill]] }
  0x2b   : > { %s234_s11 = scalar_lea.sflag [#allocation4], %s1120_s8 }
  0x2c   : > { %p791_p6 = pneg %p1129_p4 }
  0x30   : > { %s1136_s26 = scalar_lea.hbm %s1384_s0, %s647_s12  ;;  %s794_s20 = scalar_lea.hbm %s1384_s0, 2048 }
  0x31   : > { %s789_s13 = scalar_lea.hbm %s1136_s26, 512  ;;  %p795_p9 = scmp.lt.u32.totalorder %s1136_s26, %s1384_s0 }
  0x32   : > { %p790_p5 = scmp.ne.s32.totalorder %s1136_s26, %s789_s13  ;;  %p796_p10 = scmp.lt.u32.totalorder %s794_s20, %s789_s13 }
  0x33   : > { %p798_p13 = scmp.lt.u32.totalorder %s789_s13, %s1136_s26 }
  0x34   : > { %p792_p3 = pnand %p791_p6, %p790_p5  ;;  %p797_p11 = por %p796_p10, %p795_p9 }
  0x36   : > { %p793_p8 = pneg %p792_p3  ;;  %p799_p0 = por %p798_p13, %p797_p11 }
  0x38   : > { %p800_p1 = pnand %p799_p0, %p793_p8 }
  0x3a   : > { %803 = shalt.err (!%p800_p1)
}
  0x3b   : > { %s804_s15 = scalar_lea.vmem %s1125_s6, 512  ;;  %s977_s12 = smov [#allocation3]  }
  0x3c   : > { %p805_p5 = scmp.ne.s32.totalorder %s1125_s6, %s804_s15  ;;  %s809_s14 = sshll.u32 %s977_s12, 4  ;;  %s810_s14 = int_to_ptr.vmem [resolvable:$false] %s809_s14 }
  0x3d   : > { %s811_s17 = scalar_lea.vmem %s810_s14, 1024  ;;  %p812_p12 = scmp.lt.s32.totalorder %s1125_s6, %s810_s14 }
  0x3e   : > { %p807_p3 = pnand %p805_p5, %p791_p6  ;;  %p813_p9 = scmp.lt.s32.totalorder %s811_s17, %s804_s15 }
  0x40   : > { %p808_p2 = pneg %p807_p3  ;;  %p814_p10 = por %p813_p9, %p812_p12 }
  0x42   : > { %p815_p11 = pnand %p814_p10, %p808_p2 }
  0x44   : > { %818 = shalt.err (!%p815_p11)
}
  0x45   : > { %s978_s13 = smov 128   ;;  %s979_s20 = smov 8  }
  0x46   : > { %674 = dma.hbm_to_vmem [thread:$0]  (!%p1129_p4), %s1136_s26, 512, %s1125_s6, %s234_s11, %s978_s13, %s978_s13, %s979_s20  }
  0x47   : > { %p651_p8 = scmp.ge.s32.totalorder %s975_s7, 1  ;;  %p274_p12 = scmp.lt.s32.totalorder %s975_s7, 5 }
  0x48   : > { %s648_s24 = sshll.u32 %s1120_s8, 3  ;;  %s649_s15 = sshll.u32 %s971_s30, 1 }
  0x49   : > { %p1169_p2 = pnand %p651_p8, %p274_p12  ;;  %s260_s12 = scalar_lea.vmem [#allocation6], %s648_s24 }
  0x4a   : > { %s269_s14 = sshll.u32 %s260_s12, 4  ;;  %s265_s17 = sadd.s32 %s967_s29, %s649_s15  ;;  %s1175_s14 = int_to_ptr.vmem [resolvable:$true] %s269_s14 }
  0x4b   : > { %s650_s0 = sshll.u32 %s265_s17, 7  ;;  %s257_s19 = scalar_lea.sflag [#allocation7], %s1120_s8 }
  0x4c   : > { %s267_s21 = scalar_lea.hbm %s1351_s1, %s650_s0  ;;  %s824_s13 = scalar_lea.hbm %s1351_s1, 512 }
  0x4d   : > { %s819_s6 = scalar_lea.hbm %s267_s21, 128  ;;  %p825_p5 = scmp.lt.u32.totalorder %s267_s21, %s1351_s1 }
  0x4e   : > { %p820_p13 = scmp.ne.s32.totalorder %s267_s21, %s819_s6  ;;  %p826_p3 = scmp.lt.u32.totalorder %s824_s13, %s819_s6 }
  0x4f   : > { %p828_p10 = scmp.lt.u32.totalorder %s819_s6, %s267_s21 }
  0x50   : > { %p822_p0 = pnand %p820_p13, %p791_p6  ;;  %p827_p9 = por %p826_p3, %p825_p5 }
  0x52   : > { %p823_p1 = pneg %p822_p0  ;;  %p829_p11 = por %p828_p10, %p827_p9 }
  0x54   : > { %p830_p8 = pnand %p829_p11, %p823_p1 }
  0x56   : > { %833 = shalt.err (!%p830_p8)
}
  0x57   : > { %s834_s0 = scalar_lea.vmem %s1175_s14, 128  ;;  %s980_s23 = smov [#allocation6]  }
  0x58   : > { %p835_p12 = scmp.ne.s32.totalorder %s1175_s14, %s834_s0  ;;  %s839_s10 = sshll.u32 %s980_s23, 4  ;;  %s840_s10 = int_to_ptr.vmem [resolvable:$false] %s839_s10 }
  0x59   : > { %s841_s8 = scalar_lea.vmem %s840_s10, 256  ;;  %p842_p7 = scmp.lt.s32.totalorder %s1175_s14, %s840_s10 }
  0x5a   : > { %p837_p13 = pnand %p835_p12, %p791_p6  ;;  %p843_p5 = scmp.lt.s32.totalorder %s841_s8, %s834_s0 }
  0x5c   : > { %p838_p0 = pneg %p837_p13  ;;  %p844_p3 = por %p843_p5, %p842_p7 }
  0x5e   : > { %p845_p9 = pnand %p844_p3, %p838_p0 }
  0x60   : > { %848 = shalt.err (!%p845_p9)
}
  0x61   : > { %677 = dma.hbm_to_vmem [thread:$0]  (!%p1129_p4), %s267_s21, 128, %s1175_s14, %s257_s19  }
  0x62   : > { %278 = sbr.rel (%p1169_p2) target bundleno = 353 (0x161), region = 44  ;;  %s280_s15 = sand.u32 (!%p1169_p2), 1, %s951_s25  }
  0x63   : > { %s652_s12 = sshll.u32 (!%p1169_p2), %s280_s15, 5  ;;  %s281_s17 = scalar_lea.sflag (!%p1169_p2), [#allocation4], %s280_s15 }
  0x64   : > { %s284_s6 = scalar_lea.vmem (!%p1169_p2), [#allocation3], %s652_s12  ;;  %p1386_p6 = scmp.ne.s32.totalorder (!%p1169_p2), %s1376_s16, 0 }
  0x69   : > { %922 = dma.done.wait (%p1386_p6), %s281_s17, 512  }
  0x6a   : > { %924 = vsyncadd (%p1386_p6), %s281_s17, 4294966784  ;;  %s653_s26 = sshll.u32 %s280_s15, 3  ;;  %s290_s11 = scalar_lea.sflag [#allocation7], %s280_s15 }
  0x6b   : > { %s293_s9 = scalar_lea.vmem [#allocation6], %s653_s26 }
  0x6c   : > { %926 = dma.done.wait (%p1386_p6), %s290_s11, 128  }
  0x6d   : > { %928 = vsyncadd (%p1386_p6), %s290_s11, 4294967168  ;;  %s324_s21 = sand.u32 1, %s939_s22   ;;  %p655_p7 = scmp.ne.s32.totalorder %s959_s27, 0 }
  0x6e   : > { %s1213_s19 = sshll.u32 %s324_s21, 3  ;;  %vm334_vm0 = vcmask (!%p655_p7), 517120   ;;  %v981_v0 = vmov (!%p655_p7), 0.0  }
  0x6f   : > { %s326_s18 = scalar_lea.vmem [#allocation8], %s1213_s19  ;;  %333 = sbr.rel (%p655_p7) target bundleno = 118 (0x76), region = 56  ;;  %335 = vst.msk [vmem:[#allocation2] sm:$0x3] (!%p655_p7), %vm334_vm0, %v981_v0 }
  0x76 PF: > { %v336_v1 = vld [vmem:[%s284_s6] sm:$0xff]  ;;  %v337_v2 = vld [vmem:[%s284_s6 + $0x8] sm:$0xff]  ;;  %v338_v3 = vld [vmem:[%s284_s6 + $0x10] sm:$0xff]  ;;  %v982_v10 = vmov 0   ;;  %vm400_vm6 = vcmask 523264   ;;  %v983_v41 = vmov 0.0  }
  0x77   : > { %v339_v4 = vld [vmem:[%s284_s6 + $0x18] sm:$0xff]  ;;  %v340_v5 = vld [vmem:[%s293_s9] sm:$0xff]  ;;  %v342_v6 = vadd.f32 1e-10, %v336_v1  ;;  %v343_v7 = vadd.f32 1e-10, %v337_v2 }
  0x78   : > { %vm341_vm1 = vnez %v340_v5  ;;  %v344_v8 = vadd.f32 1e-10, %v338_v3  ;;  %v345_v9 = vadd.f32 1e-10, %v339_v4  ;;  %vm415_vm11 = vcmask 516096   ;;  %p660_p4 = scmp.ne.s32.totalorder %s959_s27, 1 }
  0x79   : > { %777 = vlog2.f32 %v342_v6  ;;  %v358_v11 = vsel %vm341_vm1, 16843009, %v982_v10  ;;  %s465_s10 = scalar_lea.vmem (!%p660_p4), %s1355_s5, %s963_s28  ;;  %vm468_vm12 = vcmask (!%p660_p4), 122880  }
  0x7a   : > { %779 = vlog2.f32 %v343_v7  ;;  %v359_v12 = vunpack.c.0.s8 %v358_v11  ;;  %v360_v13 = vunpack.c.1.s8 %v358_v11  ;;  %v361_v14 = vunpack.c.2.s8 %v358_v11  ;;  %v466_v36 = vld [vmem:[%s465_s10] sm:$0x1] (!%p660_p4) }
  0x7b   : > { %781 = vlog2.f32 %v344_v8  ;;  %v362_v15 = vunpack.c.3.s8 %v358_v11 }
  0x7c   : > { %783 = vlog2.f32 %v345_v9  ;;  %v363_v16 = vpack.c.b16 %v359_v12, %v359_v12  ;;  %v365_v17 = vpack.c.b16 %v360_v13, %v360_v13  ;;  %v367_v18 = vpack.c.b16 %v361_v14, %v361_v14 }
  0x7d   : > { %v369_v19 = vpack.c.b16 %v362_v15, %v362_v15 }
  0x7e   : > { %v364_v20 = vpack.c.b8 %v363_v16, %v363_v16  ;;  %v366_v21 = vpack.c.b8 %v365_v17, %v365_v17  ;;  %v368_v22 = vpack.c.b8 %v367_v18, %v367_v18  ;;  %v417_v16 = vld [vmem:[#allocation2 + $0x1] sm:$0x1] }
  0x7f   : > { %v370_v23 = vpack.c.b8 %v369_v19, %v369_v19  ;;  %v399_v19 = vld [vmem:[#allocation2] sm:$0x1] }
  0x80   : > { %vm371_vm2 = vnez %v364_v20  ;;  %vm372_vm3 = vnez %v366_v21  ;;  %vm373_vm4 = vnez %v368_v22 }
  0x81   : > { %vm374_vm5 = vnez %v370_v23  ;;  %v375_v24 = vsel %vm371_vm2, 16843009, %v982_v10  ;;  %v376_v25 = vsel %vm372_vm3, 16843009, %v982_v10  ;;  %v377_v26 = vsel %vm373_vm4, 16843009, %v982_v10 }
  0x82   : > { %v378_v27 = vsel %vm374_vm5, 16843009, %v982_v10  ;;  %v379_v28 = vunpack.c.0.s8 %v375_v24  ;;  %v380_v29 = vunpack.c.0.s8 %v376_v25  ;;  %v381_v30 = vunpack.c.0.s8 %v377_v26  ;;  %v461_v25 = vld [vmem:[%s1354_s4] sm:$0x1] (!%p660_p4) }
  0x83   : > { %v778_v31 = vpop.eup %777  ;;  %v382_v32 = vunpack.c.0.s8 %v378_v27  ;;  %v462_v27 = vmax.f32 (!%p660_p4), %v461_v25, 1e-10 }
  0x84   : > { %v780_v33 = vpop.eup %779  ;;  %v347_v34 = vmul.f32 0.6931472, %v778_v31  ;;  %vm1217_vm7 = vcmp.ne.s32.totalorder %v379_v28, 0  ;;  %vm1221_vm8 = vcmp.ne.s32.totalorder %v380_v29, 0  ;;  %vm1225_vm9 = vcmp.ne.s32.totalorder %v381_v30, 0 }
  0x85   : > { %v782_v38 = vpop.eup %781  ;;  %v349_v39 = vmul.f32 0.6931472, %v780_v33  ;;  %vm1229_vm10 = vcmp.ne.s32.totalorder %v382_v32, 0  ;;  %v656_v42 = vsel %vm1217_vm7, 1.0, %v983_v41  ;;  %v657_v43 = vsel %vm1221_vm8, 1.0, %v983_v41 }
  0x86   : > { %v784_v44 = vpop.eup %783  ;;  %v351_v45 = vmul.f32 0.6931472, %v782_v38  ;;  %v354_v46 = vsub.f32 0.0, %v347_v34  ;;  %v658_v47 = vsel %vm1225_vm9, 1.0, %v983_v41  ;;  %v659_v48 = vsel %vm1229_vm10, 1.0, %v983_v41 }
  0x87   : > { %v353_v49 = vmul.f32 0.6931472, %v784_v44  ;;  %v355_v50 = vsub.f32 0.0, %v349_v39  ;;  %v418_v51 = vsel %vm400_vm6, %v656_v42, 0.0  ;;  %v419_v52 = vsel %vm400_vm6, %v657_v43, 0.0 }
  0x88   : > { %v356_v53 = vsub.f32 0.0, %v351_v45  ;;  %v387_v54 = vsel %vm1217_vm7, %v354_v46, 0.0  ;;  %v420_v55 = vadd.f32 %v419_v52, %v418_v51  ;;  %v421_v56 = vsel %vm400_vm6, %v658_v47, 0.0  ;;  %v445_v28 = vld [vmem:[%s1353_s3] sm:$0x1] (!%p660_p4) }
  0x89   : > { %v357_v57 = vsub.f32 0.0, %v353_v49  ;;  %v388_v58 = vsel %vm1221_vm8, %v355_v50, 0.0  ;;  %v401_v59 = vsel %vm400_vm6, %v387_v54, 0.0  ;;  %v423_v60 = vsel %vm400_vm6, %v659_v48, 0.0  ;;  %v446_v29 = vld [vmem:[%s1352_s2] sm:$0x1] (!%p660_p4) }
  0x8a   : > { %v389_v61 = vsel %vm1225_vm9, %v356_v53, 0.0  ;;  %v402_v62 = vsel %vm400_vm6, %v388_v58, 0.0  ;;  %v422_v63 = vadd.f32 %v421_v56, %v420_v55  ;;  %785 = vrcp.f32 (!%p660_p4), %v462_v27  ;;  %v448_v32 = vld [vmem:[%s1353_s3 + $0x1] sm:$0x1] (!%p660_p4) }
  0x8b   : > { %v390_v0 = vsel %vm1229_vm10, %v357_v57, 0.0  ;;  %v403_v1 = vadd.f32 %v402_v62, %v401_v59  ;;  %v404_v2 = vsel %vm400_vm6, %v389_v61, 0.0  ;;  %v447_v31 = vsub.f32 (!%p660_p4), %v445_v28, %v446_v29  ;;  %v449_v33 = vld [vmem:[%s1352_s2 + $0x1] sm:$0x1] (!%p660_p4) }
  0x8c   : > { %v406_v3 = vsel %vm400_vm6, %v390_v0, 0.0  ;;  %v424_v4 = vadd.f32 %v423_v60, %v422_v63  ;;  %v450_v34 = vsub.f32 (!%p660_p4), %v448_v32, %v449_v33  ;;  %v476_v38 = vsel (!%p660_p4), %vm468_vm12, %v466_v36, 0.0 }
  0x8d   : > { %v405_v5 = vadd.f32 %v404_v2, %v403_v1  ;;  %v451_v35 = vmul.f32 (!%p660_p4), %v447_v31, %v447_v31  ;;  %v479_v50 = vlaneseq (!%p660_p4) }
  0x8e   : > { %v425_v6 = vrot.slane %v424_v4, 4  ;;  %v452_v37 = vmul.f32 (!%p660_p4), %v450_v34, %v450_v34 }
  0x8f   : > { %v407_v7 = vadd.f32 %v406_v3, %v405_v5  ;;  %v483_v52 = vshrl.u32 (!%p660_p4), %v479_v50, 7  ;;  %v480_v54 = vand.u32 (!%p660_p4), 127, %v479_v50 }
  0x90   : > { %v426_v8 = vadd.f32 %v425_v6, %v424_v4  ;;  %v453_v39 = vadd.f32 (!%p660_p4), %v452_v37, %v451_v35 }
  0x91   : > { %v408_v9 = vrot.slane %v407_v7, 4  ;;  %v484_v53 = vsub.s32 (!%p660_p4), 0, %v483_v52  ;;  %vm481_vm15 = vcmp.eq.s32.totalorder (!%p660_p4), %v480_v54, 0  ;;  %vm487_vm0 = vcmp.eq.s32.totalorder (!%p660_p4), %v480_v54, 1 }
  0x92   : > { %v427_v10 = vrot.slane %v426_v8, 2  ;;  %787 = vrsqrt.f32 (!%p660_p4), %v453_v39  ;;  %vm456_vm13 = vcmp.eq.f32.partialorder (!%p660_p4), %v453_v39, inf  ;;  %v459_v44 = vand.u32 (!%p660_p4), 2147483648, %v453_v39 }
  0x93   : > { %v409_v11 = vadd.f32 %v408_v9, %v407_v7  ;;  %vm458_vm14 = vcmp.eq.f32.partialorder (!%p660_p4), %v453_v39, 0.0  ;;  %vm494_vm1 = vcmp.eq.s32.totalorder (!%p660_p4), %v480_v54, 2  ;;  %vm501_vm2 = vcmp.eq.s32.totalorder (!%p660_p4), %v480_v54, 3 }
  0x94   : > { %v428_v12 = vadd.f32 %v427_v10, %v426_v8  ;;  %v786_v40 = vpop.eup (!%p660_p4), %785  ;;  %vm508_vm3 = vcmp.eq.s32.totalorder (!%p660_p4), %v480_v54, 4 }
  0x95   : > { %v410_v13 = vrot.slane %v409_v11, 2  ;;  %v467_v41 = vmul.f32 (!%p660_p4), %v786_v40, %v466_v36 }
  0x96   : > { %v429_v14 = vrot.slane %v428_v12, 1 }
  0x97   : > { %v411_v15 = vadd.f32 %v410_v13, %v409_v11  ;;  %v469_v42 = vsel (!%p660_p4), %vm468_vm12, %v467_v41, 0.0 }
  0x98   : > { %v430_v17 = vadd.f32 %v429_v14, %v428_v12  ;;  %470 = vadd.xlane.f32.xlu1 (!%p660_p4), %v469_v42 }
  0x99   : > { %v412_v18 = vrot.slane %v411_v15, 1  ;;  %436 = sbr.rel (%p660_p4) target bundleno = 326 (0x146), region = 60 }
  0x9a   : > { %v431_v20 = vadd.f32 %v430_v17, %v417_v16 }
  0x9b   : > { %v413_v21 = vadd.f32 %v412_v18, %v411_v15 }
  0x9c   : > { %432 = vst.msk [vmem:[#allocation2 + $0x1] sm:$0x1] %vm415_vm11, %v431_v20  ;;  %v788_v43 = vpop.eup (!%p660_p4), %787 }
  0x9d   : > { %v414_v22 = vadd.f32 %v413_v21, %v399_v19  ;;  %v455_v45 = vmul.f32 (!%p660_p4), %v788_v43, %v453_v39 }
  0x9f   : > { %416 = vst.msk [vmem:[#allocation2] sm:$0x1] %vm415_vm11, %v414_v22  ;;  %v457_v46 = vsel (!%p660_p4), %vm456_vm13, %v453_v39, %v455_v45 }
  0xa0   : > { %v460_v47 = vsel %vm458_vm14, %v459_v44, %v457_v46 }
  0xa1   : > { %v472_v48 = vmul.f32 %v467_v41, %v460_v47 }
  0xa3   : > { %v441_v24 = vld [vmem:[#allocation2 + $0x1] sm:$0x1]  ;;  %v473_v49 = vsel %vm468_vm12, %v472_v48, 0.0 }
  0xa4   : > { %v442_v30 = vsel %vm415_vm11, %v441_v24, 0.0  ;;  %474 = vadd.xlane.f32.xlu1 %v473_v49 }
  0xa6   : > { %v437_v23 = vld [vmem:[#allocation2] sm:$0x1] }
  0xa7   : > { %v438_v26 = vsel %vm415_vm11, %v437_v23, 0.0 }
  0xa8   : > { %439 = vadd.xlane.f32.xlu0 %v438_v26 }
  0xac   : > { %443 = vadd.xlane.f32.xlu0 %v442_v30 }
  0xb0   : > { %477 = vadd.xlane.f32.xlu0 %v476_v38 }
 0x125   : > { %v471_v58 = vpop.xlane.xlu1 %470 }
 0x126   : > { %v498_v61 = vrot.slane %v471_v58, %v484_v53 }
 0x128   : > { %v499_v0 = vsel %vm494_vm1, %v498_v61, 0.0 }
 0x131   : > { %v475_v2 = vpop.xlane.xlu1 %474 }
 0x132   : > { %v505_v3 = vrot.slane %v475_v2, %v484_v53 }
 0x134   : > { %v506_v5 = vsel %vm501_vm2, %v505_v3, 0.0 }
 0x135   : > { %v440_v51 = vpop.xlane.xlu0 %439 }
 0x136   : > { %v485_v56 = vrot.slane %v440_v51, %v484_v53 }
 0x138   : > { %v486_v59 = vsel %vm481_vm15, %v485_v56, 0.0 }
 0x139   : > { %v444_v55 = vpop.xlane.xlu0 %443 }
 0x13a   : > { %v491_v57 = vrot.slane %v444_v55, %v484_v53 }
 0x13c   : > { %v492_v60 = vsel %vm487_vm0, %v491_v57, 0.0 }
 0x13d   : > { %v478_v62 = vpop.xlane.xlu0 %477  ;;  %v493_v63 = vadd.f32 %v492_v60, %v486_v59 }
 0x13e   : > { %v512_v1 = vrot.slane %v478_v62, %v484_v53 }
 0x13f   : > { %v500_v4 = vadd.f32 %v499_v0, %v493_v63 }
 0x140   : > { %v513_v6 = vsel %vm508_vm3, %v512_v1, 0.0 }
 0x141   : > { %v507_v7 = vadd.f32 %v506_v5, %v500_v4 }
 0x143   : > { %v514_v8 = vadd.f32 %v513_v6, %v507_v7 }
 0x145   : > { %515 = vst [vmem:[%s326_s18] sm:$0xff] %v514_v8 }
 0x146 PF: > { %s1395_s6 = sld [smem:[#allocation17_spill]]  ;;  %s662_s26 = sshll.u32 %s963_s28, 7 }
 0x147   : > { %s1396_s16 = sld [smem:[#allocation22_spill]]  ;;  %s530_s13 = sshll.u32 %s326_s18, 4  ;;  %s531_s13 = int_to_ptr.vmem [resolvable:$true] %s530_s13 }
 0x148   : > { %s517_s20 = scalar_lea.sflag [#allocation5], %s324_s21  ;;  %s849_s24 = scalar_lea.vmem %s531_s13, 128 }
 0x149   : > { %p850_p2 = scmp.ne.s32.totalorder %s531_s13, %s849_s24  ;;  %s984_s0 = smov [#allocation8]  }
 0x14a   : > { %s853_s27 = sshll.u32 %s984_s0, 4  ;;  %s854_s27 = int_to_ptr.vmem [resolvable:$false] %s853_s27 }
 0x14b   : > { %s855_s23 = scalar_lea.vmem %s854_s27, 256  ;;  %p856_p8 = scmp.lt.s32.totalorder %s531_s13, %s854_s27 }
 0x14c   : > { %p1397_p1 = scmp.ne.s32.totalorder %s1395_s6, 0  ;;  %p857_p12 = scmp.lt.s32.totalorder %s855_s23, %s849_s24 }
 0x14d   : > { %s1290_s14 = scalar_lea.hbm %s1396_s16, %s662_s26 }
 0x14e   : > { %p851_p10 = pnand %p850_p2, %p1397_p1  ;;  %p858_p13 = por %p857_p12, %p856_p8 }
 0x150   : > { %p852_p11 = pneg %p851_p10 }
 0x152   : > { %p859_p0 = pnand %p858_p13, %p852_p11 }
 0x154   : > { %862 = shalt.err (!%p859_p0)
}
 0x155   : > { %s863_s28 = scalar_lea.hbm %s1290_s14, 128  ;;  %s867_s18 = scalar_lea.hbm %s1396_s16, 256 }
 0x156   : > { %p864_p5 = scmp.ne.s32.totalorder %s1290_s14, %s863_s28  ;;  %p868_p6 = scmp.lt.u32.totalorder %s1290_s14, %s1396_s16 }
 0x157   : > { %p869_p7 = scmp.lt.u32.totalorder %s867_s18, %s863_s28  ;;  %p871_p2 = scmp.lt.u32.totalorder %s863_s28, %s1290_s14 }
 0x158   : > { %p865_p3 = pnand %p864_p5, %p1397_p1 }
 0x159   : > { %p870_p4 = por %p869_p7, %p868_p6 }
 0x15a   : > { %p866_p9 = pneg %p865_p3 }
 0x15b   : > { %p872_p10 = por %p871_p2, %p870_p4 }
 0x15d   : > { %p873_p11 = pnand %p872_p10, %p866_p9 }
 0x15f   : > { %876 = shalt.err (!%p873_p11)
}
 0x160   : > { %669 = dma.vmem_to_hbm [thread:$0]  (%p1397_p1), %s531_s13, 128, %s1290_s14, %s517_s20  }
 0x161 PF: > { %s1398_s15 = sld [smem:[#allocation12_spill]]  ;;  %s1399_s12 = sld [smem:[#allocation20_spill]] }
 0x162   : > { %p683_p8 = scmp.ge.s32.totalorder %s975_s7, 2 }
 0x167   : > { %s542_s17 = sand.u32 1, %s1398_s15   ;;  %p1400_p12 = scmp.ne.s32.totalorder %s1399_s12, 0 }
 0x168   : > { %s543_s26 = scalar_lea.sflag [#allocation5], %s542_s17 }
 0x169   : > { %p679_p13 = pnand %p683_p8, %p1400_p12 }
 0x16b   : > { %930 = dma.done.wait (!%p679_p13), %s543_s26, 128  }
 0x16c   : > { %932 = vsyncadd (!%p679_p13), %s543_s26, 4294967168  ;;  %s25_s7 = sadd.s32 1, %s975_s7   ;;  %s1401_s11 = sld [smem:[#allocation13_spill]] }
 0x16d   : > { %p22_p0 = scmp.ge.s32.totalorder %s25_s7, 6   ;;  %s1402_s23 = sld [smem:[#allocation18_spill]] }
 0x16e   : > { %s1403_s6 = sld [smem:[#allocation14_spill]]  ;;  %s1404_s26 = sld [smem:[#allocation19_spill]] }
 0x16f   : > { %s1405_s9 = sld [smem:[#allocation15_spill]]  ;;  %s1406_s14 = sld [smem:[#allocation16_spill]] }
 0x170   : > { %s1407_s21 = smov %s939_s22  ;;  %s1409_s24 = smov %s951_s25 }
 0x171   : > { %s1411_s27 = smov %s967_s29  ;;  %s1412_s28 = smov %s971_s30 }
 0x172   : > { %s1408_s22 = smov %s1401_s11  ;;  %24 = sbr.rel (!%p22_p0) target bundleno = 14 (0xe), region = 111 }
 0x174   : > { %s1410_s25 = smov %s1403_s6 }
 0x175   : > { %s1413_s29 = smov %s1405_s9  ;;  %s1414_s30 = smov %s1406_s14 }
 0x179   :  { %548 = vsyncpa [#allocation4], 1 }
 0x17a   :  { %550 = vsyncpa [#allocation4 + $0x1], 1 }
 0x17b   :  { %551 = vsyncpa [#allocation7], 1 }
 0x17c   :  { %553 = vsyncpa [#allocation7 + $0x1], 1 }
 0x17d   :  { %554 = vsyncpa [#allocation5], 1 }
 0x17e   :  { %556 = vsyncpa [#allocation5 + $0x1], 1 }

</bundles_post_ra>
